<compile_context>
chip_gen: v6e
topology: v6e:2x2x1
jax: 0.10.0
libtpu: 0.0.40
codegen_flags: <defaults>
</compile_context>

<pallas_src>
import functools

import jax
import jax.numpy as jnp
from jax.experimental import pallas as pl
from jax.experimental.pallas import tpu as pltpu

LANE = 128
_MXU_MULT = 256            # tile multiples of 256 keep the 256-deep MXU loaded
_MAX_TILE = 2048           # cap from v7x's 64 MiB VMEM (int8 adj dbl-buf = 8 MiB)
_X_RESIDENT_BYTES = 8 << 20  # keep X fully VMEM-resident if it fits this budget


def _round_up(x, m):
    return (x + m - 1) // m * m


def _pick_tile(n, max_tile=_MAX_TILE, mult=_MXU_MULT):
    """Largest tile <= max_tile (multiple of 256) that balances the tile count."""
    n_tiles = max(1, -(-n // max_tile))
    return min(_round_up(-(-n // n_tiles), mult), max_tile)


def _gcn_kernel(adj_ref, x_ref, wt_ref, bias_ref, rs_ref, out_ref, acc_ref,
                *, tk, x_resident):
    k = pl.program_id(1)

    @pl.when(k == 0)
    def _():
        acc_ref[...] = jnp.zeros_like(acc_ref)

    # Aggregate first (contracts over F, not H):  acc(tm,Fp) += A(tm,tk) @ X(tk,Fp)
    # int8 0/1 (or bf16) adjacency upcast to bf16 on the VPU (free: loop is
    # HBM-bound), f32 MXU accumulation.
    a = adj_ref[...].astype(jnp.bfloat16)
    if x_resident:
        xk = x_ref[pl.ds(pl.multiple_of(k * tk, _MXU_MULT), tk), :]
    else:
        xk = x_ref[...]
    acc_ref[...] += jnp.dot(a, xk, preferred_element_type=jnp.float32)

    @pl.when(k == pl.num_programs(1) - 1)
    def _():
        # Epilogue: post-scale rows by d^-1/2 (identity=1 for the general path),
        # transform with W^T (both operands f32 for accuracy), add bias, single
        # lane-dense store.
        agg = acc_ref[...] * rs_ref[...]
        h = jnp.dot(agg, wt_ref[...], preferred_element_type=jnp.float32)
        out_ref[...] = (h + bias_ref[...]).astype(out_ref.dtype)


def _run_gcn(adj_p, x_p, wt_p, bias_p, rs_p, *, N, H, tm, tk):
    Nm, Nk = adj_p.shape
    Fp = x_p.shape[1]
    Hp = wt_p.shape[1]

    x_resident = (x_p.size * x_p.dtype.itemsize) <= _X_RESIDENT_BYTES
    if x_resident:
        # Constant block index -> DMA'd once, stays resident across the grid.
        x_spec = pl.BlockSpec((Nk, Fp), lambda i, k: (0, 0))
        x_buf_bytes = x_p.size * 2
    else:
        x_spec = pl.BlockSpec((tk, Fp), lambda i, k: (k, 0))
        x_buf_bytes = 2 * tk * Fp * 2

    kernel = functools.partial(_gcn_kernel, tk=tk, x_resident=x_resident)

    # VMEM budget: adjacency double-buffer + X + output double-buffer + scratch.
    adj_itemsize = jnp.dtype(adj_p.dtype).itemsize
    vmem_est = (2 * tm * tk * adj_itemsize
                + x_buf_bytes
                + 2 * tm * Hp * 4
                + tm * Fp * 4
                + 2 * (Fp * Hp * 4 + Hp * 4 + tm * 4))
    vmem_limit = min(max(int(vmem_est * 1.5) + (2 << 20), 32 << 20), 64 << 20)

    out_p = pl.pallas_call(
        kernel,
        out_shape=jax.ShapeDtypeStruct((Nm, Hp), jnp.float32),
        grid_spec=pltpu.PrefetchScalarGridSpec(
            num_scalar_prefetch=0,
            grid=(Nm // tm, Nk // tk),
            in_specs=[
                pl.BlockSpec((tm, tk), lambda i, k: (i, k)),   # adjacency stream
                x_spec,                                        # X (resident/per-k)
                pl.BlockSpec((Fp, Hp), lambda i, k: (0, 0)),   # W^T resident (f32)
                pl.BlockSpec((1, Hp), lambda i, k: (0, 0)),    # bias resident
                pl.BlockSpec((tm, 1), lambda i, k: (i, 0)),    # per-row scale
            ],
            out_specs=pl.BlockSpec((tm, Hp), lambda i, k: (i, 0)),
            scratch_shapes=[pltpu.VMEM((tm, Fp), jnp.float32)],
        ),
        compiler_params=pltpu.CompilerParams(
            dimension_semantics=("parallel", "arbitrary"),
            vmem_limit_bytes=vmem_limit,
        ),
    )(adj_p, x_p, wt_p, bias_p, rs_p)

    return out_p[:N, :H]


def preprocess_adjacency(a_binary, *, max_tile=_MAX_TILE):
    """One-time prep (do NOT redo per forward): store the 0/1 adjacency (with
    self-loops) as padded int8 and factor D^-1/2 A D^-1/2 into a pre-scale of X
    and a post-scale of the aggregate."""
    N = a_binary.shape[0]
    tm = _pick_tile(N, max_tile)
    tk = _pick_tile(N, max_tile)
    Nm = _round_up(N, tm)
    Nk = _round_up(N, tk)
    deg = jnp.sum(a_binary.astype(jnp.float32), axis=1)
    d_inv_sqrt = jnp.where(deg > 0, 1.0 / jnp.sqrt(deg), 0.0)
    adj_p = jnp.zeros((Nm, Nk), jnp.int8).at[:N, :N].set(a_binary.astype(jnp.int8))
    return {"adj_p": adj_p, "d_inv_sqrt": d_inv_sqrt, "N": N, "tm": tm, "tk": tk}


def gcn_encoder_spmm_binary(x, w, prep, bias):
    """Optimized path: out = D^-1/2 A D^-1/2 (x @ w.T) + bias, with the 0/1
    adjacency streamed as int8 (exact) and the normalization factored out."""
    N, tm, tk = prep["N"], prep["tm"], prep["tk"]
    adj_p, d_inv_sqrt = prep["adj_p"], prep["d_inv_sqrt"]
    Nm, Nk = adj_p.shape
    F = x.shape[1]
    H = w.shape[0]
    Fp = _round_up(F, LANE)
    Hp = _round_up(H, LANE)

    x_scaled = x.astype(jnp.float32) * d_inv_sqrt[:, None]
    x_p = jnp.zeros((Nk, Fp), jnp.bfloat16).at[:N, :F].set(
        x_scaled.astype(jnp.bfloat16))
    wt_p = jnp.zeros((Fp, Hp), jnp.float32).at[:F, :H].set(w.T.astype(jnp.float32))
    bias_p = jnp.zeros((1, Hp), jnp.float32).at[0, :H].set(bias.astype(jnp.float32))
    rs_p = jnp.zeros((Nm, 1), jnp.float32).at[:N, 0].set(
        d_inv_sqrt.astype(jnp.float32))
    return _run_gcn(adj_p, x_p, wt_p, bias_p, rs_p, N=N, H=H, tm=tm, tk=tk)


def gcn_encoder_spmm(x, w, adj_norm_dense, bias, *, max_tile=_MAX_TILE):
    """Module-exact interface: out = adj_norm @ (x @ w.T) + bias for an
    arbitrary pre-normalized dense adjacency (streamed in bf16).  For static
    graphs prefer preprocess_adjacency() + gcn_encoder_spmm_binary(), which
    avoids the per-call N^2 pad/cast and halves the adjacency HBM bytes."""
    N, F = x.shape
    H = w.shape[0]
    assert adj_norm_dense.shape == (N, N) and w.shape[1] == F and bias.shape == (H,)
    tm = _pick_tile(N, max_tile)
    tk = _pick_tile(N, max_tile)
    Nm = _round_up(N, tm)
    Nk = _round_up(N, tk)
    Fp = _round_up(F, LANE)
    Hp = _round_up(H, LANE)

    adj_p = jnp.zeros((Nm, Nk), jnp.bfloat16).at[:N, :N].set(
        adj_norm_dense.astype(jnp.bfloat16))
    x_p = jnp.zeros((Nk, Fp), jnp.bfloat16).at[:N, :F].set(x.astype(jnp.bfloat16))
    wt_p = jnp.zeros((Fp, Hp), jnp.float32).at[:F, :H].set(w.T.astype(jnp.float32))
    bias_p = jnp.zeros((1, Hp), jnp.float32).at[0, :H].set(bias.astype(jnp.float32))
    rs_p = jnp.ones((Nm, 1), jnp.float32)
    return _run_gcn(adj_p, x_p, wt_p, bias_p, rs_p, N=N, H=H, tm=tm, tk=tk)


def _reference(x, w, adj_dense, bias):
    return adj_dense @ (x @ w.T) + bias[None, :]


if __name__ == "__main__":
    # Small shapes implied by the module: N nodes, num_features, hidden.
    # N deliberately not a multiple of the tile size to exercise padding.
    N = 200
    NUM_FEATURES = 8
    HIDDEN = 32

    key = jax.random.PRNGKey(0)
    k_x, k_w, k_b, k_adj = jax.random.split(key, 4)

    x = jax.random.normal(k_x, (N, NUM_FEATURES), dtype=jnp.float32)

    bound = 1.0 / jnp.sqrt(jnp.float32(NUM_FEATURES))
    w = jax.random.uniform(k_w, (HIDDEN, NUM_FEATURES),
                           minval=-bound, maxval=bound, dtype=jnp.float32)
    bias = jax.random.uniform(k_b, (HIDDEN,),
                              minval=-0.1, maxval=0.1, dtype=jnp.float32)

    # Symmetric 0/1 adjacency with self loops; symmetric normalization.
    rand = jax.random.uniform(k_adj, (N, N))
    a = (rand < 0.25).astype(jnp.float32)
    a = jnp.maximum(a, a.T)
    a = a.at[jnp.arange(N), jnp.arange(N)].set(1.0)
    deg = jnp.sum(a, axis=1)
    d_inv_sqrt = 1.0 / jnp.sqrt(deg)
    adj_norm = a * d_inv_sqrt[:, None] * d_inv_sqrt[None, :]

    ref = _reference(x, w, adj_norm, bias)

    # Optimized path: preprocess once (int8 0/1 adjacency, factored norm).
    prep = preprocess_adjacency(a)
    out_bin = jax.block_until_ready(gcn_encoder_spmm_binary(x, w, prep, bias))

    # General pre-normalized path (module-exact interface).
    out_gen = jax.block_until_ready(gcn_encoder_spmm(x, w, adj_norm, bias))

    assert out_bin.shape == (N, HIDDEN) and out_gen.shape == (N, HIDDEN)
    err_bin = float(jnp.max(jnp.abs(out_bin - ref)))
    err_gen = float(jnp.max(jnp.abs(out_gen - ref)))
    # bf16 X / adjacency stream with f32 accumulate -> loose tolerance.
    assert jnp.allclose(out_bin, ref, atol=2e-2, rtol=2e-2), (
        f"binary path mismatch vs reference (max abs err {err_bin})")
    assert jnp.allclose(out_gen, ref, atol=2e-2, rtol=2e-2), (
        f"general path mismatch vs reference (max abs err {err_gen})")

    print("KERNEL_OK")
</pallas_src>

<mosaic_0001>
module attributes {stable_mosaic.version = 11 : i64} {
  func.func @_gcn_kernel(%arg0: i32, %arg1: i32, %arg2: memref<256x256xi8, #tpu.memory_space<vmem>>, %arg3: memref<256x128xbf16, #tpu.memory_space<vmem>>, %arg4: memref<128x128xf32, #tpu.memory_space<vmem>>, %arg5: memref<1x128xf32, #tpu.memory_space<vmem>>, %arg6: memref<256x1xf32, #tpu.memory_space<vmem>>, %arg7: memref<256x128xf32, #tpu.memory_space<vmem>>, %arg8: memref<256x128xf32, #tpu.memory_space<vmem>>) attributes {dimension_semantics = [#tpu.dimension_semantics<parallel>, #tpu.dimension_semantics<arbitrary>], iteration_bounds = array<i64: 1, 1>, scalar_prefetch = 0 : i64, scratch_operands = 1 : i64, tpu.core_type = #tpu.core_type<tc>, window_params = [{transform_indices = @transform_0, window_bounds = array<i64: 256, 256>}, {pipeline_mode = #tpu.pipeline_mode<synchronous>, transform_indices = @transform_1, window_bounds = array<i64: 256, 128>}, {pipeline_mode = #tpu.pipeline_mode<synchronous>, transform_indices = @transform_2, window_bounds = array<i64: 128, 128>}, {pipeline_mode = #tpu.pipeline_mode<synchronous>, transform_indices = @transform_3, window_bounds = array<i64: 1, 128>}, {transform_indices = @transform_4, window_bounds = array<i64: 256, 1>}, {transform_indices = @transform_5, window_bounds = array<i64: 256, 128>}]} {
    %c0_i32 = arith.constant 0 : i32
    %0 = arith.cmpi eq, %arg1, %c0_i32 : i32
    %1 = arith.extui %0 : i1 to i32
    %c0_i32_0 = arith.constant 0 : i32
    %2 = arith.cmpi ne, %1, %c0_i32_0 : i32
    scf.if %2 {
      %cst_9 = arith.constant 0.000000e+00 : f32
      %16 = vector.broadcast %cst_9 : f32 to vector<256x128xf32>
      %c0_10 = arith.constant 0 : index
      %c0_11 = arith.constant 0 : index
      %17 = vector.load %arg8[%c0_10, %c0_11] : memref<256x128xf32, #tpu.memory_space<vmem>>, vector<256x128xf32>
      tpu.vector_store %arg8[%c0_10, %c0_11], %16 {strides = array<i32>} : memref<256x128xf32, #tpu.memory_space<vmem>>, vector<256x128xf32>,
    } else {
    }
    %c0 = arith.constant 0 : index
    %c0_1 = arith.constant 0 : index
    %3 = vector.load %arg2[%c0, %c0_1] : memref<256x256xi8, #tpu.memory_space<vmem>>, vector<256x256xi8>
    %4 = arith.sitofp %3 : vector<256x256xi8> to vector<256x256xbf16>
    %c256_i32 = arith.constant 256 : i32
    %5 = arith.muli %arg1, %c256_i32 : i32
    %6 = tpu.assume_multiple %5, 256 : i32
    %7 = arith.index_cast %6 : i32 to index
    %c0_2 = arith.constant 0 : index
    %8 = vector.load %arg3[%7, %c0_2] : memref<256x128xbf16, #tpu.memory_space<vmem>>, vector<256x128xbf16>
    %c0_3 = arith.constant 0 : index
    %c0_4 = arith.constant 0 : index
    %9 = vector.load %arg8[%c0_3, %c0_4] : memref<256x128xf32, #tpu.memory_space<vmem>>, vector<256x128xf32>
    %cst = arith.constant dense<0.000000e+00> : vector<256x128xf32>
    %10 = tpu.matmul %4, %8, %cst {dimension_numbers = #tpu.dot_dimension_numbers<[1], [0], [0], [1], [0, 0, 1, 1], [], []>} : vector<256x256xbf16>, vector<256x128xbf16>, vector<256x128xf32> -> vector<256x128xf32>
    %11 = arith.addf %9, %10 : vector<256x128xf32>
    %c0_5 = arith.constant 0 : index
    %c0_6 = arith.constant 0 : index
    %12 = vector.load %arg8[%c0_5, %c0_6] : memref<256x128xf32, #tpu.memory_space<vmem>>, vector<256x128xf32>
    tpu.vector_store %arg8[%c0_5, %c0_6], %11 {strides = array<i32>} : memref<256x128xf32, #tpu.memory_space<vmem>>, vector<256x128xf32>,
    %c0_i32_7 = arith.constant 0 : i32
    %13 = arith.cmpi eq, %arg1, %c0_i32_7 : i32
    %14 = arith.extui %13 : i1 to i32
    %c0_i32_8 = arith.constant 0 : i32
    %15 = arith.cmpi ne, %14, %c0_i32_8 : i32
    scf.if %15 {
      %c0_9 = arith.constant 0 : index
      %c0_10 = arith.constant 0 : index
      %16 = vector.load %arg8[%c0_9, %c0_10] : memref<256x128xf32, #tpu.memory_space<vmem>>, vector<256x128xf32>
      %c0_11 = arith.constant 0 : index
      %c0_12 = arith.constant 0 : index
      %17 = vector.load %arg6[%c0_11, %c0_12] : memref<256x1xf32, #tpu.memory_space<vmem>>, vector<256x1xf32>
      %18 = vector.broadcast %17 : vector<256x1xf32> to vector<256x128xf32>
      %19 = arith.mulf %16, %18 : vector<256x128xf32>
      %c0_13 = arith.constant 0 : index
      %c0_14 = arith.constant 0 : index
      %20 = vector.load %arg4[%c0_13, %c0_14] : memref<128x128xf32, #tpu.memory_space<vmem>>, vector<128x128xf32>
      %cst_15 = arith.constant dense<0.000000e+00> : vector<256x128xf32>
      %21 = tpu.matmul %19, %20, %cst_15 {dimension_numbers = #tpu.dot_dimension_numbers<[1], [0], [0], [1], [0, 0, 1, 1], [], []>} : vector<256x128xf32>, vector<128x128xf32>, vector<256x128xf32> -> vector<256x128xf32>
      %c0_16 = arith.constant 0 : index
      %c0_17 = arith.constant 0 : index
      %22 = vector.load %arg5[%c0_16, %c0_17] : memref<1x128xf32, #tpu.memory_space<vmem>>, vector<1x128xf32>
      %23 = vector.broadcast %22 : vector<1x128xf32> to vector<256x128xf32>
      %24 = arith.addf %21, %23 : vector<256x128xf32>
      %c0_18 = arith.constant 0 : index
      %c0_19 = arith.constant 0 : index
      %25 = vector.load %arg7[%c0_18, %c0_19] : memref<256x128xf32, #tpu.memory_space<vmem>>, vector<256x128xf32>
      tpu.vector_store %arg7[%c0_18, %c0_19], %24 {strides = array<i32>} : memref<256x128xf32, #tpu.memory_space<vmem>>, vector<256x128xf32>,
    } else {
    }
    return
  }
  func.func @transform_0(%arg0: i32, %arg1: i32) -> (i32, i32) {
    %c0_i32 = arith.constant 0 : i32
    return %arg0, %arg1 : i32, i32
  }
  func.func @transform_1(%arg0: i32, %arg1: i32) -> (i32, i32) {
    %c0_i32 = arith.constant 0 : i32
    %c0_i32_0 = arith.constant 0 : i32
    %c0_i32_1 = arith.constant 0 : i32
    return %c0_i32, %c0_i32_0 : i32, i32
  }
  func.func @transform_2(%arg0: i32, %arg1: i32) -> (i32, i32) {
    %c0_i32 = arith.constant 0 : i32
    %c0_i32_0 = arith.constant 0 : i32
    %c0_i32_1 = arith.constant 0 : i32
    return %c0_i32, %c0_i32_0 : i32, i32
  }
  func.func @transform_3(%arg0: i32, %arg1: i32) -> (i32, i32) {
    %c0_i32 = arith.constant 0 : i32
    %c0_i32_0 = arith.constant 0 : i32
    %c0_i32_1 = arith.constant 0 : i32
    return %c0_i32, %c0_i32_0 : i32, i32
  }
  func.func @transform_4(%arg0: i32, %arg1: i32) -> (i32, i32) {
    %c0_i32 = arith.constant 0 : i32
    %c0_i32_0 = arith.constant 0 : i32
    return %arg0, %c0_i32 : i32, i32
  }
  func.func @transform_5(%arg0: i32, %arg1: i32) -> (i32, i32) {
    %c0_i32 = arith.constant 0 : i32
    %c0_i32_0 = arith.constant 0 : i32
    return %arg0, %c0_i32 : i32, i32
  }
}

</mosaic_0001>

<bundles_post_ra>
// kernel: tpu_custom_call.1
= control target key start
LH: loop header
LB: loop body
LE: loop exit
PB: predicated region body
PF: predicated region fallthrough
CT: control target
= control target key end

     0   :  { %10 = vsyncpa [#allocation4], 0  ;;  %s1699_s0 = inlined_call_operand.vmem [shape: s8[256,256], index: 0, kind: input, shape index: {}]   ;;  %s1700_s1 = inlined_call_operand.vmem [shape: bf16[256,128], index: 1, kind: input, shape index: {}]   ;;  %s1701_s2 = inlined_call_operand.hbm [shape: f32[128,128], index: 2, kind: input, shape index: {}]   ;;  %s1702_s3 = inlined_call_operand.vmem [shape: f32[1,128], index: 3, kind: input, shape index: {}]   ;;  %s1703_s4 = inlined_call_operand.vmem [shape: f32[256,1], index: 4, kind: input, shape index: {}]   ;;  %s1704_s5 = inlined_call_operand.hbm [shape: f32[256,128], index: 5, kind: output, shape index: {}]  }
   0x1   :  { %11 = vsyncpa [#allocation5], 0  ;;  %s1408_s18 = smov [#allocation3]  }
   0x2   :  { %s21_s19 = sshll.u32 %s1408_s18, 4  ;;  %s22_s19 = int_to_ptr.vmem [resolvable:$true] %s21_s19 }
   0x3   :  { %s1372_s20 = scalar_lea.vmem %s22_s19, 2048  ;;  %p1377_p1 = scmp.lt.s32.totalorder %s22_s19, %s22_s19 }
   0x4   :  { %p1373_p0 = scmp.ne.s32.totalorder %s22_s19, %s1372_s20  ;;  %p1378_p2 = scmp.lt.s32.totalorder %s1372_s20, %s1372_s20 }
   0x6   :  { %p1379_p3 = por %p1378_p2, %p1377_p1 }
   0x8   :  { %p1380_p4 = pnand %p1379_p3, %p1373_p0 }
   0xa   :  { %1383 = shalt.err (!%p1380_p4)
}
   0xb   :  { %s1409_s21 = smov 128   ;;  %s1410_s22 = smov 8  }
   0xc   :  { %27 = dma.hbm_to_vmem [thread:$0]  %s1701_s2, 2048, %s22_s19, [#allocation4], %s1409_s21, %s1409_s21, %s1410_s22  }
   0xd   :  { %1404 = dma.done.wait [#allocation4], 2048  }
   0xe   :  { %1405 = vsyncadd [#allocation4], 4294965248  ;;  %v1411_v0 = vmov 0   ;;  %v1348_v1 = vld [vmem:[%s1700_s1 + $0x78] sm:$0xff]   ;;  %v1350_v3 = vld [vmem:[%s1700_s1 + $0x70] sm:$0xff]  }
   0xf   :  { %1346 = vset.pattern.permute.xlu0 %v1411_v0  ;;  %1347 = vset.pattern.permute.xlu1 %v1411_v0  ;;  %v1349_v2 = vld [vmem:[%s1700_s1 + $0x38] sm:$0xff]   ;;  %v1351_v4 = vld [vmem:[%s1700_s1 + $0x30] sm:$0xff]   ;;  %v1352_v5 = vld [vmem:[%s1700_s1 + $0x68] sm:$0xff]  }
  0x10   :  { %1085 = vmatprep.subr.bf16.mxu0 %v1348_v1  ;;  %1325 = vmatprep.subr.bf16.mxu1 %v1348_v1  ;;  %v1353_v6 = vld [vmem:[%s1700_s1 + $0x28] sm:$0xff]   ;;  %v1354_v7 = vld [vmem:[%s1700_s1 + $0x60] sm:$0xff]   ;;  %v1356_v9 = vld [vmem:[%s1700_s1 + $0x58] sm:$0xff]  }
  0x11   :  { %1086 = vmatpush3.bf16.msra.mxu0 %v1349_v2  ;;  %1333 = vmatpush3.bf16.msra.mxu1 %v1349_v2  ;;  %v1355_v8 = vld [vmem:[%s1700_s1 + $0x20] sm:$0xff]   ;;  %v1357_v10 = vld [vmem:[%s1700_s1 + $0x18] sm:$0xff]   ;;  %v1358_v11 = vld [vmem:[%s1700_s1 + $0x50] sm:$0xff]  }
  0x12   :  { %1087 = vmatprep.subr.bf16.mxu0 %v1350_v3  ;;  %1326 = vmatprep.subr.bf16.mxu1 %v1350_v3  ;;  %v73_v12 = vld [vmem:[%s1699_s0 + $0x8] sm:$0xff]  ;;  %v1359_v16 = vld [vmem:[%s1700_s1 + $0x10] sm:$0xff]   ;;  %v545_v18 = vld [vmem:[%s1703_s4] sm:$0xff] }
  0x13   :  { %v89_v13 = vunpack.c.l.s8.bf16 %v73_v12  ;;  %v85_v14 = vld [vmem:[%s1699_s0 + $0x68] sm:$0xff]  ;;  %v547_v19 = vld [vmem:[%s1703_s4 + $0x10] sm:$0xff]  ;;  %579 = vperm.xlu0 %1346, %v545_v18   ;;  %v548_v22 = vld [vmem:[%s1703_s4 + $0x18] sm:$0xff]  ;;  %v91_v30 = vunpack.c.h.s8.bf16 %v73_v12 }
  0x14   :  { %v113_v15 = vunpack.c.l.s8.bf16 %v85_v14  ;;  %v1360_v17 = vld [vmem:[%s1700_s1 + $0x48] sm:$0xff]   ;;  %589 = vperm.xlu1 %1347, %v547_v19   ;;  %v1362_v23 = vld [vmem:[%s1700_s1 + $0x40] sm:$0xff]   ;;  %v551_v32 = vld [vmem:[%s1703_s4 + $0x30] sm:$0xff]  ;;  %v115_v33 = vunpack.c.h.s8.bf16 %v85_v14 }
  0x15   :  { %1088 = vmatpush3.bf16.msra.mxu0 %v1351_v4  ;;  %1334 = vmatpush3.bf16.msra.mxu1 %v1351_v4  ;;  %v1361_v20 = vld [vmem:[%s1700_s1 + $0x8] sm:$0xff]   ;;  %v1363_v24 = vld [vmem:[%s1700_s1] sm:$0xff]   ;;  %v784_v34 = vld [vmem:[#allocation3 + $0x78] sm:$0xff] }
  0x16   :  { %1089 = vmatprep.subr.bf16.mxu0 %v1352_v5  ;;  %1327 = vmatprep.subr.bf16.mxu1 %v1352_v5  ;;  %v546_v21 = vld [vmem:[%s1703_s4 + $0x8] sm:$0xff]  ;;  %v72_v25 = vld [vmem:[%s1699_s0] sm:$0xff]  ;;  %v552_v35 = vld [vmem:[%s1703_s4 + $0x38] sm:$0xff] }
  0x17   :  { %317 = vmatprep.mubr.bf16.mxu0 %v89_v13  ;;  %413 = vmatprep.mubr.bf16.mxu1 %v113_v15  ;;  %v549_v26 = vld [vmem:[%s1703_s4 + $0x20] sm:$0xff]  ;;  %v550_v27 = vld [vmem:[%s1703_s4 + $0x28] sm:$0xff]  ;;  %v88_v29 = vunpack.c.l.s8.bf16 %v72_v25  ;;  %v783_v37 = vld [vmem:[#allocation3 + $0x70] sm:$0xff]  ;;  %v90_v42 = vunpack.c.h.s8.bf16 %v72_v25 }
  0x18   :  { %584 = vperm.xlu0 %1346, %v546_v21   ;;  %594 = vperm.xlu1 %1347, %v548_v22   ;;  %v84_v28 = vld [vmem:[%s1699_s0 + $0x60] sm:$0xff]  ;;  %v75_v38 = vld [vmem:[%s1699_s0 + $0x18] sm:$0xff]  ;;  %v554_v40 = vld [vmem:[%s1703_s4 + $0x48] sm:$0xff] }
  0x19   :  { %1090 = vmatpush3.bf16.msra.mxu0 %v1353_v6  ;;  %1335 = vmatpush3.bf16.msra.mxu1 %v1353_v6  ;;  %v112_v31 = vunpack.c.l.s8.bf16 %v84_v28  ;;  %v553_v36 = vld [vmem:[%s1703_s4 + $0x40] sm:$0xff]  ;;  %v87_v39 = vld [vmem:[%s1699_s0 + $0x78] sm:$0xff]  ;;  %v782_v41 = vld [vmem:[#allocation3 + $0x68] sm:$0xff]  ;;  %v93_v43 = vunpack.c.l.s8.bf16 %v75_v38  ;;  %v114_v44 = vunpack.c.h.s8.bf16 %v84_v28  ;;  %v95_v56 = vunpack.c.h.s8.bf16 %v75_v38 }
  0x1a   :  { %1091 = vmatprep.subr.bf16.mxu0 %v1354_v7  ;;  %1328 = vmatprep.subr.bf16.mxu1 %v1354_v7  ;;  %v555_v45 = vld [vmem:[%s1703_s4 + $0x50] sm:$0xff]  ;;  %v117_v46 = vunpack.c.l.s8.bf16 %v87_v39  ;;  %v556_v47 = vld [vmem:[%s1703_s4 + $0x58] sm:$0xff]  ;;  %v781_v48 = vld [vmem:[#allocation3 + $0x60] sm:$0xff]  ;;  %v119_v59 = vunpack.c.h.s8.bf16 %v87_v39 }
  0x1b   :  { %v74_v49 = vld [vmem:[%s1699_s0 + $0x10] sm:$0xff]  ;;  %v557_v50 = vld [vmem:[%s1703_s4 + $0x60] sm:$0xff]  ;;  %v780_v52 = vld [vmem:[#allocation3 + $0x58] sm:$0xff] }
  0x1c   :  { %599 = vperm.xlu0 %1346, %v549_v26   ;;  %604 = vperm.xlu1 %1347, %v550_v27   ;;  %v86_v51 = vld [vmem:[%s1699_s0 + $0x70] sm:$0xff]  ;;  %v558_v53 = vld [vmem:[%s1703_s4 + $0x68] sm:$0xff]  ;;  %v92_v54 = vunpack.c.l.s8.bf16 %v74_v49  ;;  %v560_v60 = vld [vmem:[%s1703_s4 + $0x78] sm:$0xff]  ;;  %v94_v2 = vunpack.c.h.s8.bf16 %v74_v49 }
  0x1d   :  { %1092 = vmatpush3.bf16.msra.mxu0 %v1355_v8  ;;  %1336 = vmatpush3.bf16.msra.mxu1 %v1355_v8  ;;  %v779_v55 = vld [vmem:[#allocation3 + $0x50] sm:$0xff]  ;;  %v116_v57 = vunpack.c.l.s8.bf16 %v86_v51  ;;  %v561_v61 = vld [vmem:[%s1703_s4 + $0x80] sm:$0xff]  ;;  %v778_v62 = vld [vmem:[#allocation3 + $0x48] sm:$0xff]  ;;  %v118_v4 = vunpack.c.h.s8.bf16 %v86_v51 }
  0x1e   :  { %1093 = vmatprep.subr.bf16.mxu0 %v1356_v9  ;;  %1329 = vmatprep.subr.bf16.mxu1 %v1356_v9  ;;  %v559_v58 = vld [vmem:[%s1703_s4 + $0x70] sm:$0xff]  ;;  %v77_v63 = vld [vmem:[%s1699_s0 + $0x28] sm:$0xff]  ;;  %v777_v1 = vld [vmem:[#allocation3 + $0x40] sm:$0xff] }
  0x1f   :  { %v562_v0 = vld [vmem:[%s1703_s4 + $0x88] sm:$0xff]  ;;  %v97_v3 = vunpack.c.l.s8.bf16 %v77_v63  ;;  %v563_v5 = vld [vmem:[%s1703_s4 + $0x90] sm:$0xff]  ;;  %v564_v6 = vld [vmem:[%s1703_s4 + $0x98] sm:$0xff]  ;;  %v99_v14 = vunpack.c.h.s8.bf16 %v77_v63 }
  0x20   :  { %609 = vperm.xlu0 %1346, %v551_v32   ;;  %614 = vperm.xlu1 %1347, %v552_v35   ;;  %v776_v7 = vld [vmem:[#allocation3 + $0x38] sm:$0xff]  ;;  %v76_v8 = vld [vmem:[%s1699_s0 + $0x20] sm:$0xff]  ;;  %v774_v12 = vld [vmem:[#allocation3 + $0x28] sm:$0xff] }
  0x21   :  { %1094 = vmatpush3.bf16.msra.mxu0 %v1357_v10  ;;  %1337 = vmatpush3.bf16.msra.mxu1 %v1357_v10  ;;  %v565_v9 = vld [vmem:[%s1703_s4 + $0xa0] sm:$0xff]  ;;  %v775_v10 = vld [vmem:[#allocation3 + $0x30] sm:$0xff]  ;;  %v96_v13 = vunpack.c.l.s8.bf16 %v76_v8  ;;  %v79_v18 = vld [vmem:[%s1699_s0 + $0x38] sm:$0xff] }
  0x22   :  { %1095 = vmatprep.subr.bf16.mxu0 %v1358_v11  ;;  %1330 = vmatprep.subr.bf16.mxu1 %v1358_v11  ;;  %v566_v11 = vld [vmem:[%s1703_s4 + $0xa8] sm:$0xff]  ;;  %v567_v15 = vld [vmem:[%s1703_s4 + $0xb0] sm:$0xff]  ;;  %v101_v21 = vunpack.c.l.s8.bf16 %v79_v18  ;;  %v573_v25 = vld [vmem:[%s1703_s4 + $0xe0] sm:$0xff]  ;;  %v103_v28 = vunpack.c.h.s8.bf16 %v79_v18 }
  0x23   :  { %v570_v19 = vld [vmem:[%s1703_s4 + $0xc8] sm:$0xff]  ;;  %v571_v22 = vld [vmem:[%s1703_s4 + $0xd0] sm:$0xff]  ;;  %v83_v38 = vld [vmem:[%s1699_s0 + $0x58] sm:$0xff] }
  0x24   :  { %619 = vperm.xlu0 %1346, %v553_v36   ;;  %624 = vperm.xlu1 %1347, %v554_v40   ;;  %v574_v26 = vld [vmem:[%s1703_s4 + $0xe8] sm:$0xff]  ;;  %v772_v39 = vld [vmem:[#allocation3 + $0x18] sm:$0xff] }
  0x25   :  { %1096 = vmatpush3.bf16.msra.mxu0 %v1359_v16  ;;  %1338 = vmatpush3.bf16.msra.mxu1 %v1359_v16  ;;  %v568_v16 = vld [vmem:[%s1703_s4 + $0xb8] sm:$0xff] }
  0x26   :  { %1097 = vmatprep.subr.bf16.mxu0 %v1360_v17  ;;  %1331 = vmatprep.subr.bf16.mxu1 %v1360_v17  ;;  %v569_v17 = vld [vmem:[%s1703_s4 + $0xc0] sm:$0xff] }
  0x28   :  { %629 = vperm.xlu0 %1346, %v555_v45   ;;  %634 = vperm.xlu1 %1347, %v556_v47   ;;  %v82_v45 = vld [vmem:[%s1699_s0 + $0x50] sm:$0xff]  ;;  %v111_v47 = vunpack.c.h.s8.bf16 %v83_v38 }
  0x29   :  { %1098 = vmatpush3.bf16.msra.mxu0 %v1361_v20  ;;  %1339 = vmatpush3.bf16.msra.mxu1 %v1361_v20  ;;  %v98_v20 = vunpack.c.h.s8.bf16 %v76_v8 }
  0x2a   :  { %1099 = vmatprep.subr.bf16.mxu0 %v1362_v23  ;;  %1332 = vmatprep.subr.bf16.mxu1 %v1362_v23  ;;  %v572_v23 = vld [vmem:[%s1703_s4 + $0xd8] sm:$0xff] }
  0x2c   :  { %639 = vperm.xlu0 %1346, %v557_v50   ;;  %644 = vperm.xlu1 %1347, %v558_v53  }
  0x2d   :  { %1100 = vmatpush3.bf16.msra.mxu0 %v1363_v24  ;;  %1340 = vmatpush3.bf16.msra.mxu1 %v1363_v24  ;;  %v78_v24 = vld [vmem:[%s1699_s0 + $0x30] sm:$0xff] }
  0x2e   :  { %1245 = vmatprep.subr.mxu1 %v784_v34  ;;  %v100_v27 = vunpack.c.l.s8.bf16 %v78_v24  ;;  %v102_v32 = vunpack.c.h.s8.bf16 %v78_v24 }
  0x30   :  { %318 = vmatmul.mubr.bf16.vlgmr.msra.gmra.mxu0 %v88_v29  ;;  %414 = vmatmul.mubr.bf16.vlgmr.msra.gmra.mxu1 %v112_v31  ;;  %v575_v29 = vld [vmem:[%s1703_s4 + $0xf0] sm:$0xff]  ;;  %v81_v31 = vld [vmem:[%s1699_s0 + $0x48] sm:$0xff] }
  0x31   :  { %325 = vmatprep.mubr.bf16.mxu0 %v91_v30  ;;  %421 = vmatprep.mubr.bf16.mxu1 %v115_v33  ;;  %v576_v30 = vld [vmem:[%s1703_s4 + $0xf8] sm:$0xff]  ;;  %v105_v33 = vunpack.c.l.s8.bf16 %v81_v31  ;;  %v107_v36 = vunpack.c.h.s8.bf16 %v81_v31 }
  0x32   :  { %1246 = vmatpush3.msra.mxu1 %v784_v34  ;;  %649 = vperm.xlu0 %1346, %v559_v58   ;;  %v80_v34 = vld [vmem:[%s1699_s0 + $0x40] sm:$0xff] }
  0x33   :  { %1247 = vmatprep.subr.mxu1 %v783_v37  ;;  %654 = vperm.xlu1 %1347, %v560_v60   ;;  %v104_v35 = vunpack.c.l.s8.bf16 %v80_v34  ;;  %v106_v40 = vunpack.c.h.s8.bf16 %v80_v34 }
  0x34   :  { %1248 = vmatpush3.msra.mxu1 %v783_v37  ;;  %v773_v37 = vld [vmem:[#allocation3 + $0x20] sm:$0xff] }
  0x35   :  { %1249 = vmatprep.subr.mxu1 %v782_v41 }
  0x36   :  { %1250 = vmatpush3.msra.mxu1 %v782_v41  ;;  %659 = vperm.xlu0 %1346, %v561_v61   ;;  %v771_v41 = vld [vmem:[#allocation3 + $0x10] sm:$0xff] }
  0x37   :  { %1251 = vmatprep.subr.mxu1 %v781_v48  ;;  %664 = vperm.xlu1 %1347, %v562_v0  }
  0x38   :  { %326 = vmatmul.mubr.bf16.gmra.mxu0 %v90_v42  ;;  %422 = vmatmul.mubr.bf16.gmra.mxu1 %v114_v44  ;;  %v109_v42 = vunpack.c.l.s8.bf16 %v83_v38  ;;  %v769_v44 = vld [vmem:[#allocation3] sm:$0xff] }
  0x39   :  { %333 = vmatprep.mubr.bf16.mxu0 %v93_v43  ;;  %429 = vmatprep.mubr.bf16.mxu1 %v117_v46  ;;  %v770_v43 = vld [vmem:[#allocation3 + $0x8] sm:$0xff]  ;;  %v108_v46 = vunpack.c.l.s8.bf16 %v82_v45 }
  0x3a   :  { %1252 = vmatpush3.msra.mxu1 %v781_v48  ;;  %669 = vperm.xlu0 %1346, %v563_v5   ;;  %v110_v48 = vunpack.c.h.s8.bf16 %v82_v45 }
  0x3b   :  { %1253 = vmatprep.subr.mxu1 %v780_v52  ;;  %674 = vperm.xlu1 %1347, %v564_v6  }
  0x3c   :  { %1254 = vmatpush3.msra.mxu1 %v780_v52 }
  0x3d   :  { %1255 = vmatprep.subr.mxu1 %v779_v55 }
  0x3e   :  { %1256 = vmatpush3.msra.mxu1 %v779_v55  ;;  %679 = vperm.xlu0 %1346, %v565_v9  }
  0x3f   :  { %1257 = vmatprep.subr.mxu1 %v778_v62  ;;  %684 = vperm.xlu1 %1347, %v566_v11  }
  0x40   :  { %334 = vmatmul.mubr.bf16.gmra.mxu0 %v92_v54  ;;  %430 = vmatmul.mubr.bf16.gmra.mxu1 %v116_v57 }
  0x41   :  { %341 = vmatprep.mubr.bf16.mxu0 %v95_v56  ;;  %437 = vmatprep.mubr.bf16.mxu1 %v119_v59 }
  0x42   :  { %1258 = vmatpush3.msra.mxu1 %v778_v62  ;;  %689 = vperm.xlu0 %1346, %v567_v15  }
  0x43   :  { %1259 = vmatprep.subr.mxu1 %v777_v1  ;;  %694 = vperm.xlu1 %1347, %v568_v16  }
  0x44   :  { %1260 = vmatpush3.msra.mxu1 %v777_v1 }
  0x45   :  { %1261 = vmatprep.subr.mxu1 %v776_v7 }
  0x46   :  { %1262 = vmatpush3.msra.mxu1 %v776_v7  ;;  %699 = vperm.xlu0 %1346, %v569_v17  }
  0x47   :  { %1263 = vmatprep.subr.mxu1 %v775_v10  ;;  %704 = vperm.xlu1 %1347, %v570_v19  }
  0x48   :  { %342 = vmatmul.mubr.bf16.gmra.mxu0 %v94_v2  ;;  %438 = vmatmul.mubr.bf16.gmra.mxu1 %v118_v4 }
  0x49   :  { %349 = vmatprep.mubr.bf16.mxu0 %v97_v3  ;;  %1264 = vmatpush3.msra.mxu1 %v775_v10 }
  0x4a   :  { %1265 = vmatprep.subr.mxu1 %v774_v12  ;;  %709 = vperm.xlu0 %1346, %v571_v22  }
  0x4b   :  { %1266 = vmatpush3.msra.mxu1 %v774_v12  ;;  %714 = vperm.xlu1 %1347, %v572_v23  }
  0x4c   :  { %1267 = vmatprep.subr.mxu1 %v773_v37 }
  0x4d   :  { %1268 = vmatpush3.msra.mxu1 %v773_v37 }
  0x4e   :  { %719 = vperm.xlu0 %1346, %v573_v25   ;;  %1269 = vmatprep.subr.mxu1 %v772_v39 }
  0x4f   :  { %724 = vperm.xlu1 %1347, %v574_v26   ;;  %1270 = vmatpush3.msra.mxu1 %v772_v39 }
  0x50   :  { %350 = vmatmul.mubr.bf16.gmra.mxu0 %v96_v13  ;;  %1271 = vmatprep.subr.mxu1 %v771_v41 }
  0x51   :  { %357 = vmatprep.mubr.bf16.mxu0 %v99_v14  ;;  %1272 = vmatpush3.msra.mxu1 %v771_v41 }
  0x52   :  { %729 = vperm.xlu0 %1346, %v575_v29   ;;  %1273 = vmatprep.subr.mxu1 %v770_v43 }
  0x53   :  { %734 = vperm.xlu1 %1347, %v576_v30   ;;  %1274 = vmatpush3.msra.mxu1 %v770_v43 }
  0x54   :  { %1275 = vmatprep.subr.mxu1 %v769_v44 }
  0x55   :  { %1276 = vmatpush3.msra.mxu1 %v769_v44 }
  0x58   :  { %358 = vmatmul.mubr.bf16.gmra.mxu0 %v98_v20 }
  0x59   :  { %365 = vmatprep.mubr.bf16.mxu0 %v101_v21 }
  0x60   :  { %366 = vmatmul.mubr.bf16.gmra.mxu0 %v100_v27 }
  0x61   :  { %373 = vmatprep.mubr.bf16.mxu0 %v103_v28 }
  0x68   :  { %374 = vmatmul.mubr.bf16.gmra.mxu0 %v102_v32 }
  0x69   :  { %381 = vmatprep.mubr.bf16.mxu0 %v105_v33 }
  0x70   :  { %382 = vmatmul.mubr.bf16.gmra.mxu0 %v104_v35 }
  0x71   :  { %389 = vmatprep.mubr.bf16.mxu0 %v107_v36 }
  0x78   :  { %390 = vmatmul.mubr.bf16.gmra.mxu0 %v106_v40 }
  0x79   :  { %397 = vmatprep.mubr.bf16.mxu0 %v109_v42 }
  0x80   :  { %398 = vmatmul.mubr.bf16.gmra.mxu0 %v108_v46 }
  0x81   :  { %405 = vmatprep.mubr.bf16.mxu0 %v111_v47 }
  0x88   :  { %406 = vmatmul.mubr.bf16.gmra.mxu0 %v110_v48 }
  0x8e   :  { %v580_v50 = vpop.permute.xlu0 %579 }
  0x8f   :  { %v590_v60 = vpop.permute.xlu1 %589 }
  0x93   :  { %v585_v57 = vpop.permute.xlu0 %584  ;;  %v595_v3 = vpop.permute.xlu1 %594 }
  0x97   :  { %v600_v8 = vpop.permute.xlu0 %599  ;;  %v605_v13 = vpop.permute.xlu1 %604 }
  0x9b   :  { %v610_v18 = vpop.permute.xlu0 %609  ;;  %v615_v23 = vpop.permute.xlu1 %614 }
  0x9f   :  { %v620_v28 = vpop.permute.xlu0 %619  ;;  %v625_v33 = vpop.permute.xlu1 %624 }
  0xa3   :  { %v630_v38 = vpop.permute.xlu0 %629  ;;  %v635_v44 = vpop.permute.xlu1 %634 }
  0xf0   :  { %v1101_v49 = vpop.f32.mrf.mxu0  ;;  %v1641_v41 = vpop.f32.mrf.mxu1 }
  0xf2   :  { %v1102_v51 = vpop.f32.mrf.mxu0  ;;  %v1643_v47 = vpop.f32.mrf.mxu1 }
  0xf3   :  { %v1103_v52 = vadd.f32 %v1102_v51, %v1101_v49 }
  0xf4   :  { %v1104_v53 = vpop.f32.mrf.mxu0 }
  0xf5   :  { %v737_v54 = vmul.f32 %v1103_v52, %v580_v50  ;;  %v640_v50 = vpop.permute.xlu0 %639 }
  0xf6   :  { %v1105_v55 = vpop.f32.mrf.mxu0 }
  0xf7   :  { %v1106_v56 = vadd.f32 %v1105_v55, %v1104_v53  ;;  %1277 = vmatprep.mubr.f32.mxu1 %v737_v54  ;;  %v1645_v53 = vpop.f32.mrf.mxu1  ;;  %v645_v55 = vpop.permute.xlu1 %644 }
  0xf8   :  { %v1107_v58 = vpop.f32.mrf.mxu0 }
  0xf9   :  { %v738_v59 = vmul.f32 %v1106_v56, %v585_v57 }
  0xfa   :  { %v1108_v61 = vpop.f32.mrf.mxu0 }
  0xfb   :  { %v1109_v62 = vadd.f32 %v1108_v61, %v1107_v58  ;;  %1278 = vmatmul.mubr.f32.vlgmr.msra.gmra.mxu1 %v738_v59  ;;  %v1647_v59 = vpop.f32.mrf.mxu1  ;;  %v650_v61 = vpop.permute.xlu0 %649 }
  0xfc   :  { %v1110_v63 = vpop.f32.mrf.mxu0 }
  0xfd   :  { %v739_v0 = vmul.f32 %v1109_v62, %v590_v60 }
  0xfe   :  { %v1111_v1 = vpop.f32.mrf.mxu0 }
  0xff   :  { %v1112_v2 = vadd.f32 %v1111_v1, %v1110_v63  ;;  %1280 = vmatprep.mubr.f32.mxu1 %v739_v0  ;;  %v655_v0 = vpop.permute.xlu1 %654 }
 0x100   :  { %v1113_v4 = vpop.f32.mrf.mxu0 }
 0x101   :  { %v740_v5 = vmul.f32 %v1112_v2, %v595_v3  ;;  %v1649_v2 = vpop.f32.mrf.mxu1 }
 0x102   :  { %v1114_v6 = vpop.f32.mrf.mxu0 }
 0x103   :  { %v1115_v7 = vadd.f32 %v1114_v6, %v1113_v4  ;;  %1281 = vmatmul.mubr.f32.gmra.mxu1 %v740_v5  ;;  %v660_v6 = vpop.permute.xlu0 %659 }
 0x104   :  { %v1116_v9 = vpop.f32.mrf.mxu0 }
 0x105   :  { %v741_v10 = vmul.f32 %v1115_v7, %v600_v8  ;;  %v1180_v8 = vpop.f32.mrf.mxu1 }
 0x106   :  { %v1117_v11 = vpop.f32.mrf.mxu0 }
 0x107   :  { %v1118_v12 = vadd.f32 %v1117_v11, %v1116_v9  ;;  %1283 = vmatprep.mubr.f32.mxu1 %v741_v10  ;;  %v665_v10 = vpop.permute.xlu1 %664 }
 0x108   :  { %v1119_v14 = vpop.f32.mrf.mxu0 }
 0x109   :  { %v742_v15 = vmul.f32 %v1118_v12, %v605_v13 }
 0x10a   :  { %v1120_v16 = vpop.f32.mrf.mxu0 }
 0x10b   :  { %v1121_v17 = vadd.f32 %v1120_v16, %v1119_v14  ;;  %1284 = vmatmul.mubr.f32.gmra.mxu1 %v742_v15  ;;  %v1182_v14 = vpop.f32.mrf.mxu1  ;;  %v670_v16 = vpop.permute.xlu0 %669 }
 0x10c   :  { %v1122_v19 = vpop.f32.mrf.mxu0 }
 0x10d   :  { %v743_v20 = vmul.f32 %v1121_v17, %v610_v18 }
 0x10e   :  { %v1123_v21 = vpop.f32.mrf.mxu0 }
 0x10f   :  { %v1124_v22 = vadd.f32 %v1123_v21, %v1122_v19  ;;  %1286 = vmatprep.mubr.f32.mxu1 %v743_v20  ;;  %v675_v19 = vpop.permute.xlu1 %674  ;;  %v1183_v21 = vpop.f32.mrf.mxu1 }
 0x110   :  { %v1125_v24 = vpop.f32.mrf.mxu0 }
 0x111   :  { %v744_v25 = vmul.f32 %v1124_v22, %v615_v23 }
 0x112   :  { %v1126_v26 = vpop.f32.mrf.mxu0 }
 0x113   :  { %v1127_v27 = vadd.f32 %v1126_v26, %v1125_v24  ;;  %1287 = vmatmul.mubr.f32.gmra.mxu1 %v744_v25  ;;  %v680_v25 = vpop.permute.xlu0 %679 }
 0x114   :  { %v1128_v29 = vpop.f32.mrf.mxu0 }
 0x115   :  { %v745_v30 = vmul.f32 %v1127_v27, %v620_v28  ;;  %v1185_v27 = vpop.f32.mrf.mxu1 }
 0x116   :  { %v1129_v31 = vpop.f32.mrf.mxu0 }
 0x117   :  { %v1130_v32 = vadd.f32 %v1129_v31, %v1128_v29  ;;  %1289 = vmatprep.mubr.f32.mxu1 %v745_v30  ;;  %v685_v29 = vpop.permute.xlu1 %684 }
 0x118   :  { %v1131_v34 = vpop.f32.mrf.mxu0 }
 0x119   :  { %v746_v35 = vmul.f32 %v1130_v32, %v625_v33  ;;  %v1186_v33 = vpop.f32.mrf.mxu1 }
 0x11a   :  { %v1132_v36 = vpop.f32.mrf.mxu0 }
 0x11b   :  { %v1133_v37 = vadd.f32 %v1132_v36, %v1131_v34  ;;  %1290 = vmatmul.mubr.f32.gmra.mxu1 %v746_v35  ;;  %v690_v35 = vpop.permute.xlu0 %689 }
 0x11c   :  { %v1134_v39 = vpop.f32.mrf.mxu0 }
 0x11d   :  { %v747_v40 = vmul.f32 %v1133_v37, %v630_v38  ;;  %v695_v38 = vpop.permute.xlu1 %694 }
 0x11e   :  { %v1135_v42 = vpop.f32.mrf.mxu0 }
 0x11f   :  { %v1136_v43 = vadd.f32 %v1135_v42, %v1134_v39  ;;  %1292 = vmatprep.mubr.f32.mxu1 %v747_v40  ;;  %v1188_v40 = vpop.f32.mrf.mxu1 }
 0x120   :  { %v1137_v45 = vpop.f32.mrf.mxu0 }
 0x121   :  { %v748_v46 = vmul.f32 %v1136_v43, %v635_v44 }
 0x122   :  { %v1138_v48 = vpop.f32.mrf.mxu0 }
 0x123   :  { %v1139_v49 = vadd.f32 %v1138_v48, %v1137_v45  ;;  %1293 = vmatmul.mubr.f32.gmra.mxu1 %v748_v46  ;;  %v700_v45 = vpop.permute.xlu0 %699  ;;  %v1189_v48 = vpop.f32.mrf.mxu1 }
 0x124   :  { %v1140_v51 = vpop.f32.mrf.mxu0 }
 0x125   :  { %v749_v52 = vmul.f32 %v1139_v49, %v640_v50 }
 0x126   :  { %v1141_v54 = vpop.f32.mrf.mxu0 }
 0x127   :  { %v1142_v56 = vadd.f32 %v1141_v54, %v1140_v51  ;;  %1295 = vmatprep.mubr.f32.mxu1 %v749_v52  ;;  %v705_v51 = vpop.permute.xlu1 %704 }
 0x128   :  { %v1143_v57 = vpop.f32.mrf.mxu0 }
 0x129   :  { %v750_v58 = vmul.f32 %v1142_v56, %v645_v55  ;;  %v1175_v55 = vadd.f32 %v1643_v47, %v1641_v41  ;;  %v1191_v56 = vpop.f32.mrf.mxu1  ;;  %v1187_v41 = vadd.f32 %v1186_v33, %v1185_v27 }
 0x12a   :  { %v1144_v60 = vpop.f32.mrf.mxu0 }
 0x12b   :  { %v1145_v62 = vadd.f32 %v1144_v60, %v1143_v57  ;;  %1296 = vmatmul.mubr.f32.gmra.mxu1 %v750_v58  ;;  %v710_v58 = vpop.permute.xlu0 %709 }
 0x12c   :  { %v1146_v63 = vpop.f32.mrf.mxu0 }
 0x12d   :  { %v751_v1 = vmul.f32 %v1145_v62, %v650_v61  ;;  %v1178_v61 = vadd.f32 %v1647_v59, %v1645_v53 }
 0x12e   :  { %v1147_v3 = vpop.f32.mrf.mxu0 }
 0x12f   :  { %v1148_v4 = vadd.f32 %v1147_v3, %v1146_v63  ;;  %1298 = vmatprep.mubr.f32.mxu1 %v751_v1  ;;  %v1181_v63 = vadd.f32 %v1180_v8, %v1649_v2  ;;  %v715_v1 = vpop.permute.xlu1 %714  ;;  %v1192_v3 = vpop.f32.mrf.mxu1 }
 0x130   :  { %v1149_v5 = vpop.f32.mrf.mxu0  ;;  %v1193_v59 = vadd.f32 %v1192_v3, %v1191_v56 }
 0x131   :  { %v752_v7 = vmul.f32 %v1148_v4, %v655_v0  ;;  %v761_v0 = vmul.f32 %v1175_v55, %v700_v45  ;;  %v1184_v4 = vadd.f32 %v1183_v21, %v1182_v14  ;;  %v763_v47 = vmul.f32 %v1181_v63, %v710_v58 }
 0x132   :  { %v1150_v9 = vpop.f32.mrf.mxu0 }
 0x133   :  { %v1151_v11 = vadd.f32 %v1150_v9, %v1149_v5  ;;  %1299 = vmatmul.mubr.f32.gmra.mxu1 %v752_v7  ;;  %v762_v5 = vmul.f32 %v1178_v61, %v705_v51  ;;  %v1194_v7 = vpop.f32.mrf.mxu1  ;;  %v725_v9 = vpop.permute.xlu1 %724 }
 0x134   :  { %v1152_v12 = vpop.f32.mrf.mxu0 }
 0x135   :  { %v753_v13 = vmul.f32 %v1151_v11, %v660_v6  ;;  %v720_v6 = vpop.permute.xlu0 %719  ;;  %v764_v11 = vmul.f32 %v1184_v4, %v715_v1 }
 0x136   :  { %v1153_v15 = vpop.f32.mrf.mxu0  ;;  %v765_v53 = vmul.f32 %v1187_v41, %v720_v6 }
 0x137   :  { %v1154_v17 = vadd.f32 %v1153_v15, %v1152_v12  ;;  %1301 = vmatprep.mubr.f32.mxu1 %v753_v13  ;;  %v1195_v12 = vpop.f32.mrf.mxu1  ;;  %v735_v14 = vpop.permute.xlu1 %734 }
 0x138   :  { %v1155_v18 = vpop.f32.mrf.mxu0  ;;  %v1196_v13 = vadd.f32 %v1195_v12, %v1194_v7 }
 0x139   :  { %v754_v20 = vmul.f32 %v1154_v17, %v665_v10  ;;  %v1190_v10 = vadd.f32 %v1189_v48, %v1188_v40  ;;  %v730_v2 = vpop.permute.xlu0 %729  ;;  %v1659_v17 = vld [vmem:[%s1702_s3] ss:$0 sm:$0xff]  ;;  %s1412_s3 = smov [#allocation6]  }
 0x13a   :  { %v1156_v22 = vpop.f32.mrf.mxu0  ;;  %v767_v15 = vmul.f32 %v1193_v59, %v730_v2  ;;  %s1054_s29 = sshll.u32 %s1412_s3, 4  ;;  %s1055_s29 = int_to_ptr.vmem [resolvable:$true] %s1054_s29 }
 0x13b   :  { %v1157_v23 = vadd.f32 %v1156_v22, %v1155_v18  ;;  %1302 = vmatmul.mubr.f32.gmra.mxu1 %v754_v20  ;;  %v766_v8 = vmul.f32 %v1190_v10, %v725_v9  ;;  %s1384_s30 = scalar_lea.vmem %s1055_s29, 4096  ;;  %p1389_p6 = scmp.lt.s32.totalorder %s1055_s29, %s1055_s29 }
 0x13c   :  { %v1158_v24 = vpop.f32.mrf.mxu0  ;;  %p1385_p5 = scmp.ne.s32.totalorder %s1055_s29, %s1384_s30  ;;  %p1390_p7 = scmp.lt.s32.totalorder %s1384_s30, %s1384_s30 }
 0x13d   :  { %v755_v26 = vmul.f32 %v1157_v23, %v670_v16  ;;  %v768_v16 = vmul.f32 %v1196_v13, %v735_v14 }
 0x13e   :  { %v1159_v28 = vpop.f32.mrf.mxu0  ;;  %p1391_p8 = por %p1390_p7, %p1389_p6 }
 0x13f   :  { %v1160_v30 = vadd.f32 %v1159_v28, %v1158_v24  ;;  %1304 = vmatprep.mubr.f32.mxu1 %v755_v26 }
 0x140   :  { %v1161_v31 = vpop.f32.mrf.mxu0  ;;  %p1392_p9 = pnand %p1391_p8, %p1385_p5 }
 0x141   :  { %v756_v32 = vmul.f32 %v1160_v30, %v675_v19 }
 0x142   :  { %v1162_v34 = vpop.f32.mrf.mxu0 }
 0x143   :  { %v1163_v36 = vadd.f32 %v1162_v34, %v1161_v31  ;;  %1305 = vmatmul.mubr.f32.gmra.mxu1 %v756_v32 }
 0x144   :  { %v1164_v37 = vpop.f32.mrf.mxu0 }
 0x145   :  { %v757_v39 = vmul.f32 %v1163_v36, %v680_v25 }
 0x146   :  { %v1165_v42 = vpop.f32.mrf.mxu0 }
 0x147   :  { %v1166_v43 = vadd.f32 %v1165_v42, %v1164_v37  ;;  %1307 = vmatprep.mubr.f32.mxu1 %v757_v39 }
 0x148   :  { %v1167_v44 = vpop.f32.mrf.mxu0 }
 0x149   :  { %v758_v46 = vmul.f32 %v1166_v43, %v685_v29 }
 0x14a   :  { %v1168_v49 = vpop.f32.mrf.mxu0 }
 0x14b   :  { %v1169_v50 = vadd.f32 %v1168_v49, %v1167_v44  ;;  %1308 = vmatmul.mubr.f32.gmra.mxu1 %v758_v46 }
 0x14c   :  { %v1170_v52 = vpop.f32.mrf.mxu0 }
 0x14d   :  { %v759_v54 = vmul.f32 %v1169_v50, %v690_v35 }
 0x14e   :  { %v1171_v57 = vpop.f32.mrf.mxu0 }
 0x14f   :  { %v1172_v60 = vadd.f32 %v1171_v57, %v1170_v52  ;;  %1310 = vmatprep.mubr.f32.mxu1 %v759_v54 }
 0x151   :  { %v760_v62 = vmul.f32 %v1172_v60, %v695_v38 }
 0x153   :  { %1311 = vmatmul.mubr.f32.gmra.mxu1 %v760_v62 }
 0x154   :  { %1313 = vmatprep.mubr.f32.mxu1 %v761_v0 }
 0x157   :  { %1314 = vmatmul.mubr.f32.gmra.mxu1 %v762_v5 }
 0x158   :  { %1316 = vmatprep.mubr.f32.mxu1 %v763_v47 }
 0x15b   :  { %1317 = vmatmul.mubr.f32.gmra.mxu1 %v764_v11 }
 0x15c   :  { %1319 = vmatprep.mubr.f32.mxu1 %v765_v53 }
 0x15f   :  { %1320 = vmatmul.mubr.f32.gmra.mxu1 %v766_v8 }
 0x160   :  { %1322 = vmatprep.mubr.f32.mxu1 %v767_v15 }
 0x163   :  { %1323 = vmatmul.mubr.f32.gmra.mxu1 %v768_v16 }
 0x1bb   :  { %v1279_v18 = vpop.f32.mrf.mxu1 }
 0x1bc   :  { %v864_v19 = vadd.f32 %v1279_v18, %v1659_v17 }
 0x1bd   :  { %v858_v20 = vpop.f32.mrf.mxu1 }
 0x1be   :  { %1018 = vst [vmem:[#allocation6 + $0x8] sm:$0xff] %v864_v19  ;;  %v859_v21 = vadd.f32 %v1659_v17, %v858_v20 }
 0x1c0   :  { %1017 = vst [vmem:[#allocation6] sm:$0xff] %v859_v21 }
 0x1c3   :  { %v1282_v22 = vpop.f32.mrf.mxu1 }
 0x1c4   :  { %v874_v23 = vadd.f32 %v1282_v22, %v1659_v17 }
 0x1c5   :  { %v868_v24 = vpop.f32.mrf.mxu1 }
 0x1c6   :  { %1020 = vst [vmem:[#allocation6 + $0x18] sm:$0xff] %v874_v23  ;;  %v869_v25 = vadd.f32 %v1659_v17, %v868_v24 }
 0x1c8   :  { %1019 = vst [vmem:[#allocation6 + $0x10] sm:$0xff] %v869_v25 }
 0x1cb   :  { %v1285_v26 = vpop.f32.mrf.mxu1 }
 0x1cc   :  { %v884_v27 = vadd.f32 %v1285_v26, %v1659_v17 }
 0x1cd   :  { %v878_v28 = vpop.f32.mrf.mxu1 }
 0x1ce   :  { %1022 = vst [vmem:[#allocation6 + $0x28] sm:$0xff] %v884_v27  ;;  %v879_v29 = vadd.f32 %v1659_v17, %v878_v28 }
 0x1d0   :  { %1021 = vst [vmem:[#allocation6 + $0x20] sm:$0xff] %v879_v29 }
 0x1d3   :  { %v1288_v30 = vpop.f32.mrf.mxu1 }
 0x1d4   :  { %v894_v31 = vadd.f32 %v1288_v30, %v1659_v17 }
 0x1d5   :  { %v888_v32 = vpop.f32.mrf.mxu1 }
 0x1d6   :  { %1024 = vst [vmem:[#allocation6 + $0x38] sm:$0xff] %v894_v31  ;;  %v889_v33 = vadd.f32 %v1659_v17, %v888_v32 }
 0x1d8   :  { %1023 = vst [vmem:[#allocation6 + $0x30] sm:$0xff] %v889_v33 }
 0x1db   :  { %v1291_v34 = vpop.f32.mrf.mxu1 }
 0x1dc   :  { %v904_v35 = vadd.f32 %v1291_v34, %v1659_v17 }
 0x1dd   :  { %v898_v36 = vpop.f32.mrf.mxu1 }
 0x1de   :  { %1026 = vst [vmem:[#allocation6 + $0x48] sm:$0xff] %v904_v35  ;;  %v899_v37 = vadd.f32 %v1659_v17, %v898_v36 }
 0x1e0   :  { %1025 = vst [vmem:[#allocation6 + $0x40] sm:$0xff] %v899_v37 }
 0x1e3   :  { %v1294_v38 = vpop.f32.mrf.mxu1 }
 0x1e4   :  { %v914_v39 = vadd.f32 %v1294_v38, %v1659_v17 }
 0x1e5   :  { %v908_v40 = vpop.f32.mrf.mxu1 }
 0x1e6   :  { %1028 = vst [vmem:[#allocation6 + $0x58] sm:$0xff] %v914_v39  ;;  %v909_v42 = vadd.f32 %v1659_v17, %v908_v40 }
 0x1e8   :  { %1027 = vst [vmem:[#allocation6 + $0x50] sm:$0xff] %v909_v42 }
 0x1eb   :  { %v1297_v43 = vpop.f32.mrf.mxu1 }
 0x1ec   :  { %v924_v44 = vadd.f32 %v1297_v43, %v1659_v17 }
 0x1ed   :  { %v918_v45 = vpop.f32.mrf.mxu1 }
 0x1ee   :  { %1030 = vst [vmem:[#allocation6 + $0x68] sm:$0xff] %v924_v44  ;;  %v919_v46 = vadd.f32 %v1659_v17, %v918_v45 }
 0x1f0   :  { %1029 = vst [vmem:[#allocation6 + $0x60] sm:$0xff] %v919_v46 }
 0x1f3   :  { %v1300_v48 = vpop.f32.mrf.mxu1 }
 0x1f4   :  { %v934_v49 = vadd.f32 %v1300_v48, %v1659_v17 }
 0x1f5   :  { %v928_v50 = vpop.f32.mrf.mxu1 }
 0x1f6   :  { %1032 = vst [vmem:[#allocation6 + $0x78] sm:$0xff] %v934_v49  ;;  %v929_v51 = vadd.f32 %v1659_v17, %v928_v50 }
 0x1f8   :  { %1031 = vst [vmem:[#allocation6 + $0x70] sm:$0xff] %v929_v51 }
 0x1fb   :  { %v1303_v52 = vpop.f32.mrf.mxu1 }
 0x1fc   :  { %v944_v54 = vadd.f32 %v1303_v52, %v1659_v17 }
 0x1fd   :  { %v938_v55 = vpop.f32.mrf.mxu1 }
 0x1fe   :  { %1034 = vst [vmem:[#allocation6 + $0x88] sm:$0xff] %v944_v54  ;;  %v939_v56 = vadd.f32 %v1659_v17, %v938_v55 }
 0x200   :  { %1033 = vst [vmem:[#allocation6 + $0x80] sm:$0xff] %v939_v56 }
 0x203   :  { %v1306_v57 = vpop.f32.mrf.mxu1 }
 0x204   :  { %v954_v58 = vadd.f32 %v1306_v57, %v1659_v17 }
 0x205   :  { %v948_v60 = vpop.f32.mrf.mxu1 }
 0x206   :  { %1036 = vst [vmem:[#allocation6 + $0x98] sm:$0xff] %v954_v58  ;;  %v949_v61 = vadd.f32 %v1659_v17, %v948_v60 }
 0x208   :  { %1035 = vst [vmem:[#allocation6 + $0x90] sm:$0xff] %v949_v61 }
 0x20b   :  { %v1309_v62 = vpop.f32.mrf.mxu1 }
 0x20c   :  { %v964_v63 = vadd.f32 %v1309_v62, %v1659_v17 }
 0x20d   :  { %v958_v0 = vpop.f32.mrf.mxu1 }
 0x20e   :  { %1038 = vst [vmem:[#allocation6 + $0xa8] sm:$0xff] %v964_v63  ;;  %v959_v1 = vadd.f32 %v1659_v17, %v958_v0 }
 0x210   :  { %1037 = vst [vmem:[#allocation6 + $0xa0] sm:$0xff] %v959_v1 }
 0x213   :  { %v1312_v3 = vpop.f32.mrf.mxu1 }
 0x214   :  { %v974_v4 = vadd.f32 %v1312_v3, %v1659_v17 }
 0x215   :  { %v968_v5 = vpop.f32.mrf.mxu1 }
 0x216   :  { %1040 = vst [vmem:[#allocation6 + $0xb8] sm:$0xff] %v974_v4  ;;  %v969_v6 = vadd.f32 %v1659_v17, %v968_v5 }
 0x217   :  { %v1315_v41 = vpop.f32.mrf.mxu1 }
 0x218   :  { %1039 = vst [vmem:[#allocation6 + $0xb0] sm:$0xff] %v969_v6  ;;  %v984_v47 = vadd.f32 %v1315_v41, %v1659_v17 }
 0x219   :  { %v978_v7 = vpop.f32.mrf.mxu1 }
 0x21a   :  { %1042 = vst [vmem:[#allocation6 + $0xc8] sm:$0xff] %v984_v47  ;;  %v979_v9 = vadd.f32 %v1659_v17, %v978_v7 }
 0x21b   :  { %v1318_v10 = vpop.f32.mrf.mxu1 }
 0x21c   :  { %1041 = vst [vmem:[#allocation6 + $0xc0] sm:$0xff] %v979_v9  ;;  %v994_v11 = vadd.f32 %v1318_v10, %v1659_v17 }
 0x21d   :  { %v988_v53 = vpop.f32.mrf.mxu1 }
 0x21e   :  { %1044 = vst [vmem:[#allocation6 + $0xd8] sm:$0xff] %v994_v11  ;;  %v989_v59 = vadd.f32 %v1659_v17, %v988_v53 }
 0x21f   :  { %v1321_v12 = vpop.f32.mrf.mxu1 }
 0x220   :  { %1043 = vst [vmem:[#allocation6 + $0xd0] sm:$0xff] %v989_v59  ;;  %v1004_v2 = vadd.f32 %v1321_v12, %v1659_v17 }
 0x221   :  { %v998_v8 = vpop.f32.mrf.mxu1 }
 0x222   :  { %1046 = vst [vmem:[#allocation6 + $0xe8] sm:$0xff] %v1004_v2  ;;  %v999_v13 = vadd.f32 %v1659_v17, %v998_v8 }
 0x223   :  { %v1324_v15 = vpop.f32.mrf.mxu1 }
 0x224   :  { %1045 = vst [vmem:[#allocation6 + $0xe0] sm:$0xff] %v999_v13  ;;  %v1014_v14 = vadd.f32 %v1324_v15, %v1659_v17 }
 0x225   :  { %v1008_v16 = vpop.f32.mrf.mxu1 }
 0x226   :  { %1048 = vst [vmem:[#allocation6 + $0xf8] sm:$0xff] %v1014_v14  ;;  %v1009_v18 = vadd.f32 %v1659_v17, %v1008_v16 }
 0x228   :  { %1047 = vst [vmem:[#allocation6 + $0xf0] sm:$0xff] %v1009_v18 }
 0x229   :  { %1395 = shalt.err (!%p1392_p9)
}
 0x22a   :  { %1060 = dma.vmem_to_hbm [thread:$0]  %s1055_s29, 4096, %s1704_s5, [#allocation5], %s1409_s21, %s1409_s21, %s1410_s22  }
 0x22b   :  { %1406 = dma.done.wait [#allocation5], 4096  }
 0x22c   :  { %1407 = vsyncadd [#allocation5], 4294963200 }
 0x22d   :  { %1064 = vsyncpa [#allocation4], 1 }
 0x22e   :  { %1065 = vsyncpa [#allocation5], 1 }

</bundles_post_ra>
